<compile_context>
chip_gen: v6e
topology: v6e:2x2x1
jax: 0.10.0
libtpu: 0.0.40
codegen_flags: <defaults>
</compile_context>

<pallas_src>
import functools
import math

import jax
import jax.numpy as jnp
from jax import lax
from jax.experimental import pallas as pl
from jax.experimental.pallas import tpu as pltpu


@functools.lru_cache(maxsize=None)
def _vmem_limit_bytes():
    """Per-generation scoped-VMEM limit: ~3/4 of physical, capped at 96 MiB.

    128 MiB parts (v5e/v6e) -> 96 MiB; 64 MiB parts (v7x) -> 48 MiB.
    Falls back to a conservative 48 MiB if the hardware query is unavailable.
    """
    try:
        cap = int(pltpu.get_tpu_info().vmem_capacity_bytes)
    except Exception:
        cap = 64 * 1024 * 1024
    return min((cap * 3) // 4, 96 * 1024 * 1024)


def _row_tile(m, tm):
    """Row-tile size: multiple of 8 (or == m), and >=2 grid steps when possible
    so both v7x TensorCores get work on the 'parallel' row axis."""
    tm = min(tm, m)
    if tm == m and m > 8:
        tm = min(m, (((m + 1) // 2) + 7) // 8 * 8)
    return tm


# ----------------------------------------------------------------------------
# Linear: y = x @ W + b.  W already (Cin, Cout); rows AND output columns tiled.
# ----------------------------------------------------------------------------
def _linear_kernel(x_ref, w_ref, b_ref, o_ref):
    y = jnp.dot(x_ref[...], w_ref[...], preferred_element_type=jnp.float32)
    o_ref[...] = (y + b_ref[...].astype(jnp.float32)).astype(o_ref.dtype)


def pallas_linear(x, w_t, b, tm=256, tn=512):
    """x: (M, Cin), w_t: (Cin, Cout) (pre-transposed), b: (Cout,) -> (M, Cout)."""
    M, Cin = x.shape
    Cout = w_t.shape[1]
    tm = _row_tile(M, tm)
    tn = min(tn, Cout)          # default tn is a multiple of 128; smaller Cout -> full dim
    grid = (pl.cdiv(M, tm), pl.cdiv(Cout, tn))
    itemsize = x.dtype.itemsize
    cost = pl.CostEstimate(
        flops=2 * M * Cin * Cout,
        transcendentals=0,
        bytes_accessed=(M * Cin + Cin * Cout + Cout + M * Cout) * itemsize,
    )
    # TODO(synk): for very large Cin add a K-reduction grid axis ("arbitrary")
    #             with an f32 accumulator scratch (init/finalize via pl.when).
    return pl.pallas_call(
        _linear_kernel,
        out_shape=jax.ShapeDtypeStruct((M, Cout), x.dtype),
        grid=grid,
        in_specs=[
            pl.BlockSpec((tm, Cin), lambda i, j: (i, 0)),   # resident across j
            pl.BlockSpec((Cin, tn), lambda i, j: (0, j)),
            pl.BlockSpec((1, tn), lambda i, j: (0, j)),
        ],
        out_specs=pl.BlockSpec((tm, tn), lambda i, j: (i, j)),
        compiler_params=pltpu.CompilerParams(
            dimension_semantics=("parallel", "parallel"),
            vmem_limit_bytes=_vmem_limit_bytes()),
        cost_estimate=cost,
    )(x, w_t, b.reshape(1, Cout))


# ----------------------------------------------------------------------------
# Fused self-attention projection: one activation read, three (M, C) outputs.
# ----------------------------------------------------------------------------
def _qkv_kernel(x_ref, wq_ref, wk_ref, wv_ref, bq_ref, bk_ref, bv_ref,
                q_ref, k_ref, v_ref):
    x = x_ref[...]                                   # activation tile, read once
    for w_ref, b_ref, o_ref in ((wq_ref, bq_ref, q_ref),
                                (wk_ref, bk_ref, k_ref),
                                (wv_ref, bv_ref, v_ref)):
        y = jnp.dot(x, w_ref[...], preferred_element_type=jnp.float32)
        o_ref[...] = (y + b_ref[...].astype(jnp.float32)).astype(o_ref.dtype)


def pallas_qkv(x, wq_t, wk_t, wv_t, bq, bk, bv, tm=256, tn=512):
    """Fused Q/K/V projection.  x: (M, C) -> (q, k, v), each (M, C)."""
    M, C = x.shape
    tm = _row_tile(M, tm)
    tn = min(tn, C)
    grid = (pl.cdiv(M, tm), pl.cdiv(C, tn))
    itemsize = x.dtype.itemsize
    cost = pl.CostEstimate(
        flops=3 * 2 * M * C * C,
        transcendentals=0,
        bytes_accessed=(M * C + 3 * C * C + 3 * C + 3 * M * C) * itemsize,
    )
    w_spec = pl.BlockSpec((C, tn), lambda i, j: (0, j))
    b_spec = pl.BlockSpec((1, tn), lambda i, j: (0, j))
    o_spec = pl.BlockSpec((tm, tn), lambda i, j: (i, j))
    o_shape = jax.ShapeDtypeStruct((M, C), x.dtype)
    return pl.pallas_call(
        _qkv_kernel,
        out_shape=(o_shape, o_shape, o_shape),
        grid=grid,
        in_specs=[
            pl.BlockSpec((tm, C), lambda i, j: (i, 0)),   # resident across j
            w_spec, w_spec, w_spec,
            b_spec, b_spec, b_spec,
        ],
        out_specs=(o_spec, o_spec, o_spec),
        compiler_params=pltpu.CompilerParams(
            dimension_semantics=("parallel", "parallel"),
            vmem_limit_bytes=_vmem_limit_bytes()),
        cost_estimate=cost,
    )(x, wq_t, wk_t, wv_t, bq.reshape(1, C), bk.reshape(1, C), bv.reshape(1, C))


# ----------------------------------------------------------------------------
# Flash attention: online softmax over an "arbitrary" Lk grid axis.
# ----------------------------------------------------------------------------
def _flash_attn_kernel(q_ref, k_ref, v_ref, o_ref, m_sc, l_sc, acc_sc,
                       *, n_head, scale, lk, needs_mask):
    kv = pl.program_id(2)

    @pl.when(kv == 0)
    def _():
        m_sc[...] = jnp.full(m_sc.shape, -jnp.inf, dtype=m_sc.dtype)
        l_sc[...] = jnp.zeros(l_sc.shape, dtype=l_sc.dtype)
        acc_sc[...] = jnp.zeros(acc_sc.shape, dtype=acc_sc.dtype)

    tq, C = q_ref.shape
    tk = k_ref.shape[0]
    D = C // n_head

    # Fold 1/sqrt(D) into the (tq, C) Q slab once per step instead of scaling
    # every (tq, tk) score matrix (weak-typed scalar keeps the input dtype).
    q = q_ref[...] * scale
    k = k_ref[...]
    v = v_ref[...]

    if needs_mask:
        # Ragged last kv tile: zero padded V rows so 0-weighted garbage can
        # never contaminate the PV matmul.
        row = kv * tk + lax.broadcasted_iota(jnp.int32, v.shape, 0)
        v = jnp.where(row < lk, v, jnp.zeros_like(v))

    for h in range(n_head):                          # static unroll over heads
        lo = h * D
        qh = q[:, lo:lo + D]                         # (tq, D)
        kh = k[:, lo:lo + D]                         # (tk, D)
        vh = v[:, lo:lo + D]                         # (tk, D)
        # Contract the D dims directly -- no K transpose through the XLU.
        s = lax.dot_general(qh, kh, (((1,), (1,)), ((), ())),
                            preferred_element_type=jnp.float32)   # (tq, tk) f32
        if needs_mask:
            col = kv * tk + lax.broadcasted_iota(jnp.int32, s.shape, 1)
            s = jnp.where(col < lk, s, -jnp.inf)

        m_prev = m_sc[h]                             # (tq, 1) f32
        m_new = jnp.maximum(m_prev, jnp.max(s, axis=-1, keepdims=True))
        alpha = jnp.exp(m_prev - m_new)              # (tq, 1)
        p = jnp.exp(s - m_new)                       # (tq, tk), unnormalized
        l_sc[h] = alpha * l_sc[h] + jnp.sum(p, axis=-1, keepdims=True)
        pv = jnp.dot(p.astype(vh.dtype), vh, preferred_element_type=jnp.float32)
        # Per-head sink straight into the lane-dense accumulator (bounds live
        # ranges; no jnp.concatenate of n_head partial outputs).
        acc_sc[:, lo:lo + D] = alpha * acc_sc[:, lo:lo + D] + pv
        m_sc[h] = m_new

    @pl.when(kv == pl.num_programs(2) - 1)
    def _():
        # Normalize AFTER the PV accumulation: exact reciprocal on a (tq, 1)
        # vector broadcast over D lanes, then ONE lane-dense (tq, C) store.
        for h in range(n_head):
            lo = h * D
            acc_sc[:, lo:lo + D] = acc_sc[:, lo:lo + D] * pl.reciprocal(l_sc[h])
        o_ref[...] = acc_sc[...].astype(o_ref.dtype)


def pallas_flash_attention(qp, kp, vp, n_head, tq=256, tk=512):
    """qp: (B, Lq, C), kp/vp: (B, Lk, C) -> (B, Lq, C)."""
    B, Lq, C = qp.shape
    Lk = kp.shape[1]
    D = C // n_head
    tq = min(tq, Lq)
    tk = min(tk, Lk)
    needs_mask = (Lk % tk) != 0
    grid = (B, pl.cdiv(Lq, tq), pl.cdiv(Lk, tk))
    sq = pl.Squeezed()
    itemsize = qp.dtype.itemsize
    n_q_tiles = pl.cdiv(Lq, tq)
    cost = pl.CostEstimate(
        flops=4 * B * n_head * Lq * Lk * D,
        transcendentals=B * n_head * Lq * Lk,
        bytes_accessed=(2 * B * Lq * C + 2 * B * Lk * C * n_q_tiles) * itemsize,
    )
    kernel = functools.partial(
        _flash_attn_kernel, n_head=n_head, scale=1.0 / math.sqrt(D),
        lk=Lk, needs_mask=needs_mask)
    return pl.pallas_call(
        kernel,
        out_shape=jax.ShapeDtypeStruct((B, Lq, C), qp.dtype),
        grid=grid,
        in_specs=[
            pl.BlockSpec((sq, tq, C), lambda b, i, j: (b, i, 0)),
            pl.BlockSpec((sq, tk, C), lambda b, i, j: (b, j, 0)),
            pl.BlockSpec((sq, tk, C), lambda b, i, j: (b, j, 0)),
        ],
        out_specs=pl.BlockSpec((sq, tq, C), lambda b, i, j: (b, i, 0)),
        scratch_shapes=[
            pltpu.VMEM((n_head, tq, 1), jnp.float32),   # running max
            pltpu.VMEM((n_head, tq, 1), jnp.float32),   # running denominator
            pltpu.VMEM((tq, C), jnp.float32),           # lane-dense accumulator
        ],
        compiler_params=pltpu.CompilerParams(
            dimension_semantics=("parallel", "parallel", "arbitrary"),
            vmem_limit_bytes=_vmem_limit_bytes()),
        cost_estimate=cost,
    )(qp, kp, vp)


# ----------------------------------------------------------------------------
# Full module forward
# ----------------------------------------------------------------------------
def init_params(key, ndim):
    # Deterministic PyTorch-style init: U(-1/sqrt(fan_in), 1/sqrt(fan_in)).
    # Weights are kept in the PyTorch (out, in) layout.
    bound = 1.0 / math.sqrt(ndim)
    keys = jax.random.split(key, 8)
    names = ["key", "query", "value", "proj"]
    params = {}
    for i, n in enumerate(names):
        params[f"{n}_w"] = jax.random.uniform(
            keys[2 * i], (ndim, ndim), jnp.float32, -bound, bound)
        params[f"{n}_b"] = jax.random.uniform(
            keys[2 * i + 1], (ndim,), jnp.float32, -bound, bound)
    return params


def mhdpa_forward(params, q, k, v, n_head, mask=None, compute_dtype=None):
    # TODO(synk): optional `mask` (masked_fill(-inf)) not wired into the flash
    #             kernel; only the mask=None path is implemented.
    assert mask is None, "mask is not implemented in the Pallas kernels"
    B, Lq, C = q.shape
    Lk = k.shape[1]
    Lv = v.shape[1]
    assert Lk == Lv, "attention requires Lk == Lv"

    # Optional reduced-precision compute path (bf16 hits the quoted MXU peaks);
    # default None keeps the module's f32 semantics.  Accumulation and softmax
    # statistics stay f32 either way.
    def cvt(a):
        return a if compute_dtype is None else a.astype(compute_dtype)

    # Weights are transposed here once to (Cin, Cout); in production this is
    # done at parameter-load time so it never re-runs.
    wq_t = cvt(params["query_w"].T)
    wk_t = cvt(params["key_w"].T)
    wv_t = cvt(params["value_w"].T)
    wp_t = cvt(params["proj_w"].T)
    bq = cvt(params["query_b"])
    bk = cvt(params["key_b"])
    bv = cvt(params["value_b"])
    bp = cvt(params["proj_b"])

    if (q is k) and (k is v):
        # Self-attention: fused projection reads the activation from HBM once
        # and emits Q/K/V as three separate arrays (no (B, L, 3C) slice
        # round-trip through HBM).  NOTE: gated on object identity; equal but
        # distinct arrays take the unfused (3x activation reads) path below.
        x2 = cvt(q).reshape(B * Lq, C)
        qp, kp, vp = pallas_qkv(x2, wq_t, wk_t, wv_t, bq, bk, bv)
        qp = qp.reshape(B, Lq, C)
        kp = kp.reshape(B, Lq, C)
        vp = vp.reshape(B, Lq, C)
    else:
        qp = pallas_linear(cvt(q).reshape(B * Lq, C), wq_t, bq).reshape(B, Lq, C)
        kp = pallas_linear(cvt(k).reshape(B * Lk, C), wk_t, bk).reshape(B, Lk, C)
        vp = pallas_linear(cvt(v).reshape(B * Lv, C), wv_t, bv).reshape(B, Lv, C)

    # Heads are split inside the kernel; no (B, H, L, D) transposes in HBM.
    y = pallas_flash_attention(qp, kp, vp, n_head)              # (B, Lq, C)
    y = pallas_linear(y.reshape(B * Lq, C), wp_t, bp)
    out = y.reshape(B, Lq, C)
    return out if compute_dtype is None else out.astype(q.dtype)


# Pure-JAX reference for correctness checking.
def mhdpa_reference(params, q, k, v, n_head):
    B, Lq, C = q.shape
    Lk = k.shape[1]
    D = C // n_head

    def lin(x, w, b):
        return x @ w.T + b

    kp = lin(k, params["key_w"], params["key_b"]).reshape(B, Lk, n_head, D).transpose(0, 2, 1, 3)
    qp = lin(q, params["query_w"], params["query_b"]).reshape(B, Lq, n_head, D).transpose(0, 2, 1, 3)
    vp = lin(v, params["value_w"], params["value_b"]).reshape(B, Lk, n_head, D).transpose(0, 2, 1, 3)
    att = (qp @ jnp.swapaxes(kp, -2, -1)) * (1.0 / math.sqrt(D))
    att = jax.nn.softmax(att, axis=-1)
    y = (att @ vp).transpose(0, 2, 1, 3).reshape(B, Lq, C)
    return lin(y, params["proj_w"], params["proj_b"])


def _attn_reference(qp, kp, vp, n_head):
    B, Lq, C = qp.shape
    Lk = kp.shape[1]
    D = C // n_head
    qh = qp.reshape(B, Lq, n_head, D).transpose(0, 2, 1, 3)
    kh = kp.reshape(B, Lk, n_head, D).transpose(0, 2, 1, 3)
    vh = vp.reshape(B, Lk, n_head, D).transpose(0, 2, 1, 3)
    att = jax.nn.softmax((qh @ jnp.swapaxes(kh, -2, -1)) / math.sqrt(D), axis=-1)
    return (att @ vh).transpose(0, 2, 1, 3).reshape(B, Lq, C)


if __name__ == "__main__":
    B, L, C, H = 2, 8, 32, 4          # batch, seq, channels, heads (dropout eval = identity)
    root = jax.random.PRNGKey(0)
    kq, kk, kv_, kparam, k3q, k3k, k3v = jax.random.split(root, 7)
    params = init_params(kparam, C)

    # Exact reciprocal is now used for the softmax normalization; the remaining
    # tolerance covers MXU default-precision f32 matmuls and the flash
    # (tile-wise) accumulation order.
    ATOL = RTOL = 2e-3

    # 1) Self-attention (exercises the fused-QKV three-output path).
    x = jax.random.normal(kq, (B, L, C), jnp.float32)
    out_self = jax.block_until_ready(mhdpa_forward(params, x, x, x, H))
    ref_self = mhdpa_reference(params, x, x, x, H)
    assert out_self.shape == (B, L, C)
    assert jnp.allclose(out_self, ref_self, atol=ATOL, rtol=RTOL), \
        "self-attention mismatch vs reference"

    # 2) Cross-attention with distinct q/k/v and Lk != Lq (unfused projections).
    Lk = 16
    q = jax.random.normal(kq, (B, L, C), jnp.float32)
    k = jax.random.normal(kk, (B, Lk, C), jnp.float32)
    v = jax.random.normal(kv_, (B, Lk, C), jnp.float32)
    out_x = jax.block_until_ready(mhdpa_forward(params, q, k, v, H))
    ref_x = mhdpa_reference(params, q, k, v, H)
    assert out_x.shape == (B, L, C)
    assert jnp.allclose(out_x, ref_x, atol=ATOL, rtol=RTOL), \
        "cross-attention mismatch vs reference"

    # 3) Explicitly exercise the online-softmax path: multiple kv tiles along
    #    the "arbitrary" axis, including a ragged (masked) last tile.
    Lk3 = 12
    qp = jax.random.normal(k3q, (B, L, C), jnp.float32)
    kp = jax.random.normal(k3k, (B, Lk3, C), jnp.float32)
    vp = jax.random.normal(k3v, (B, Lk3, C), jnp.float32)
    out_f = jax.block_until_ready(pallas_flash_attention(qp, kp, vp, H, tq=8, tk=8))
    ref_f = _attn_reference(qp, kp, vp, H)
    assert out_f.shape == (B, L, C)
    assert jnp.allclose(out_f, ref_f, atol=ATOL, rtol=RTOL), \
        "flash (multi-tile Lk) attention mismatch vs reference"

    print("KERNEL_OK")
</pallas_src>

<mosaic_0001>
module attributes {stable_mosaic.version = 11 : i64} {
  func.func @_qkv_kernel(%arg0: i32, %arg1: i32, %arg2: memref<8x32xf32, #tpu.memory_space<vmem>>, %arg3: memref<32x32xf32, #tpu.memory_space<vmem>>, %arg4: memref<32x32xf32, #tpu.memory_space<vmem>>, %arg5: memref<32x32xf32, #tpu.memory_space<vmem>>, %arg6: memref<1x32xf32, #tpu.memory_space<vmem>>, %arg7: memref<1x32xf32, #tpu.memory_space<vmem>>, %arg8: memref<1x32xf32, #tpu.memory_space<vmem>>, %arg9: memref<8x32xf32, #tpu.memory_space<vmem>>, %arg10: memref<8x32xf32, #tpu.memory_space<vmem>>, %arg11: memref<8x32xf32, #tpu.memory_space<vmem>>) attributes {dimension_semantics = [#tpu.dimension_semantics<parallel>, #tpu.dimension_semantics<parallel>], iteration_bounds = array<i64: 2, 1>, scalar_prefetch = 0 : i64, scratch_operands = 0 : i64, tpu.core_type = #tpu.core_type<tc>, window_params = [{transform_indices = @transform_0, window_bounds = array<i64: 8, 32>}, {transform_indices = @transform_1, window_bounds = array<i64: 32, 32>}, {transform_indices = @transform_2, window_bounds = array<i64: 32, 32>}, {transform_indices = @transform_3, window_bounds = array<i64: 32, 32>}, {transform_indices = @transform_4, window_bounds = array<i64: 1, 32>}, {transform_indices = @transform_5, window_bounds = array<i64: 1, 32>}, {transform_indices = @transform_6, window_bounds = array<i64: 1, 32>}, {transform_indices = @transform_7, window_bounds = array<i64: 8, 32>}, {transform_indices = @transform_8, window_bounds = array<i64: 8, 32>}, {transform_indices = @transform_9, window_bounds = array<i64: 8, 32>}]} {
    %c0 = arith.constant 0 : index
    %c0_0 = arith.constant 0 : index
    %0 = vector.load %arg2[%c0, %c0_0] : memref<8x32xf32, #tpu.memory_space<vmem>>, vector<8x32xf32>
    %c0_1 = arith.constant 0 : index
    %c0_2 = arith.constant 0 : index
    %1 = vector.load %arg3[%c0_1, %c0_2] : memref<32x32xf32, #tpu.memory_space<vmem>>, vector<32x32xf32>
    %cst = arith.constant dense<0.000000e+00> : vector<8x32xf32>
    %2 = tpu.matmul %0, %1, %cst {dimension_numbers = #tpu.dot_dimension_numbers<[1], [0], [0], [1], [0, 0, 1, 1], [], []>} : vector<8x32xf32>, vector<32x32xf32>, vector<8x32xf32> -> vector<8x32xf32>
    %c0_3 = arith.constant 0 : index
    %c0_4 = arith.constant 0 : index
    %3 = vector.load %arg6[%c0_3, %c0_4] : memref<1x32xf32, #tpu.memory_space<vmem>>, vector<1x32xf32>
    %4 = vector.broadcast %3 : vector<1x32xf32> to vector<8x32xf32>
    %5 = arith.addf %2, %4 : vector<8x32xf32>
    %c0_5 = arith.constant 0 : index
    %c0_6 = arith.constant 0 : index
    %6 = vector.load %arg9[%c0_5, %c0_6] : memref<8x32xf32, #tpu.memory_space<vmem>>, vector<8x32xf32>
    tpu.vector_store %arg9[%c0_5, %c0_6], %5 {strides = array<i32>} : memref<8x32xf32, #tpu.memory_space<vmem>>, vector<8x32xf32>,
    %c0_7 = arith.constant 0 : index
    %c0_8 = arith.constant 0 : index
    %7 = vector.load %arg4[%c0_7, %c0_8] : memref<32x32xf32, #tpu.memory_space<vmem>>, vector<32x32xf32>
    %cst_9 = arith.constant dense<0.000000e+00> : vector<8x32xf32>
    %8 = tpu.matmul %0, %7, %cst_9 {dimension_numbers = #tpu.dot_dimension_numbers<[1], [0], [0], [1], [0, 0, 1, 1], [], []>} : vector<8x32xf32>, vector<32x32xf32>, vector<8x32xf32> -> vector<8x32xf32>
    %c0_10 = arith.constant 0 : index
    %c0_11 = arith.constant 0 : index
    %9 = vector.load %arg7[%c0_10, %c0_11] : memref<1x32xf32, #tpu.memory_space<vmem>>, vector<1x32xf32>
    %10 = vector.broadcast %9 : vector<1x32xf32> to vector<8x32xf32>
    %11 = arith.addf %8, %10 : vector<8x32xf32>
    %c0_12 = arith.constant 0 : index
    %c0_13 = arith.constant 0 : index
    %12 = vector.load %arg10[%c0_12, %c0_13] : memref<8x32xf32, #tpu.memory_space<vmem>>, vector<8x32xf32>
    tpu.vector_store %arg10[%c0_12, %c0_13], %11 {strides = array<i32>} : memref<8x32xf32, #tpu.memory_space<vmem>>, vector<8x32xf32>,
    %c0_14 = arith.constant 0 : index
    %c0_15 = arith.constant 0 : index
    %13 = vector.load %arg5[%c0_14, %c0_15] : memref<32x32xf32, #tpu.memory_space<vmem>>, vector<32x32xf32>
    %cst_16 = arith.constant dense<0.000000e+00> : vector<8x32xf32>
    %14 = tpu.matmul %0, %13, %cst_16 {dimension_numbers = #tpu.dot_dimension_numbers<[1], [0], [0], [1], [0, 0, 1, 1], [], []>} : vector<8x32xf32>, vector<32x32xf32>, vector<8x32xf32> -> vector<8x32xf32>
    %c0_17 = arith.constant 0 : index
    %c0_18 = arith.constant 0 : index
    %15 = vector.load %arg8[%c0_17, %c0_18] : memref<1x32xf32, #tpu.memory_space<vmem>>, vector<1x32xf32>
    %16 = vector.broadcast %15 : vector<1x32xf32> to vector<8x32xf32>
    %17 = arith.addf %14, %16 : vector<8x32xf32>
    %c0_19 = arith.constant 0 : index
    %c0_20 = arith.constant 0 : index
    %18 = vector.load %arg11[%c0_19, %c0_20] : memref<8x32xf32, #tpu.memory_space<vmem>>, vector<8x32xf32>
    tpu.vector_store %arg11[%c0_19, %c0_20], %17 {strides = array<i32>} : memref<8x32xf32, #tpu.memory_space<vmem>>, vector<8x32xf32>,
    return
  }
  func.func @transform_0(%arg0: i32, %arg1: i32) -> (i32, i32) {
    %c0_i32 = arith.constant 0 : i32
    %c0_i32_0 = arith.constant 0 : i32
    return %arg0, %c0_i32 : i32, i32
  }
  func.func @transform_1(%arg0: i32, %arg1: i32) -> (i32, i32) {
    %c0_i32 = arith.constant 0 : i32
    %c0_i32_0 = arith.constant 0 : i32
    return %c0_i32, %arg1 : i32, i32
  }
  func.func @transform_2(%arg0: i32, %arg1: i32) -> (i32, i32) {
    %c0_i32 = arith.constant 0 : i32
    %c0_i32_0 = arith.constant 0 : i32
    return %c0_i32, %arg1 : i32, i32
  }
  func.func @transform_3(%arg0: i32, %arg1: i32) -> (i32, i32) {
    %c0_i32 = arith.constant 0 : i32
    %c0_i32_0 = arith.constant 0 : i32
    return %c0_i32, %arg1 : i32, i32
  }
  func.func @transform_4(%arg0: i32, %arg1: i32) -> (i32, i32) {
    %c0_i32 = arith.constant 0 : i32
    %c0_i32_0 = arith.constant 0 : i32
    return %c0_i32, %arg1 : i32, i32
  }
  func.func @transform_5(%arg0: i32, %arg1: i32) -> (i32, i32) {
    %c0_i32 = arith.constant 0 : i32
    %c0_i32_0 = arith.constant 0 : i32
    return %c0_i32, %arg1 : i32, i32
  }
  func.func @transform_6(%arg0: i32, %arg1: i32) -> (i32, i32) {
    %c0_i32 = arith.constant 0 : i32
    %c0_i32_0 = arith.constant 0 : i32
    return %c0_i32, %arg1 : i32, i32
  }
  func.func @transform_7(%arg0: i32, %arg1: i32) -> (i32, i32) {
    %c0_i32 = arith.constant 0 : i32
    return %arg0, %arg1 : i32, i32
  }
  func.func @transform_8(%arg0: i32, %arg1: i32) -> (i32, i32) {
    %c0_i32 = arith.constant 0 : i32
    return %arg0, %arg1 : i32, i32
  }
  func.func @transform_9(%arg0: i32, %arg1: i32) -> (i32, i32) {
    %c0_i32 = arith.constant 0 : i32
    return %arg0, %arg1 : i32, i32
  }
}

</mosaic_0001>

<bundles_post_ra>
// kernel: tpu_custom_call.1
= control target key start
LH: loop header
LB: loop body
LE: loop exit
PB: predicated region body
PF: predicated region fallthrough
CT: control target
= control target key end

     0   :  { %s1797_s0 = inlined_call_operand.hbm [shape: f32[16,32], index: 0, kind: input, shape index: {}]   ;;  %s1798_s1 = inlined_call_operand.hbm [shape: f32[32,32], index: 1, kind: input, shape index: {}]   ;;  %s1799_s2 = inlined_call_operand.hbm [shape: f32[32,32], index: 2, kind: input, shape index: {}]   ;;  %s1800_s3 = inlined_call_operand.hbm [shape: f32[32,32], index: 3, kind: input, shape index: {}]   ;;  %s1801_s4 = inlined_call_operand.vmem [shape: f32[1,32], index: 4, kind: input, shape index: {}]   ;;  %s1802_s5 = inlined_call_operand.vmem [shape: f32[1,32], index: 5, kind: input, shape index: {}]   ;;  %s1803_s6 = inlined_call_operand.vmem [shape: f32[1,32], index: 6, kind: input, shape index: {}]   ;;  %s1804_s7 = inlined_call_operand.hbm [shape: f32[16,32], index: 7, kind: output, shape index: {0}]   ;;  %s1805_s8 = inlined_call_operand.hbm [shape: f32[16,32], index: 8, kind: output, shape index: {1}]   ;;  %s1806_s9 = inlined_call_operand.hbm [shape: f32[16,32], index: 9, kind: output, shape index: {2}]  }
   0x1   :  { %1813 = sst [smem:[#allocation21_spill]] %s1798_s1 }
   0x2   :  { %1814 = sst [smem:[#allocation22_spill]] %s1799_s2 }
   0x3   :  { %1815 = sst [smem:[#allocation23_spill]] %s1800_s3 }
   0x4   :  { %15 = vsyncpa [#allocation3], 0 }
   0x5   :  { %17 = vsyncpa [#allocation3 + $0x1], 0 }
   0x6   :  { %18 = vsyncpa [#allocation6], 0 }
   0x7   :  { %19 = vsyncpa [#allocation9], 0 }
   0x8   :  { %20 = vsyncpa [#allocation4], 0 }
   0x9   :  { %22 = vsyncpa [#allocation4 + $0x1], 0 }
   0xa   :  { %23 = vsyncpa [#allocation12], 0 }
   0xb   :  { %25 = vsyncpa [#allocation12 + $0x1], 0  ;;  %s1510_s30 = smov 0   ;;  %s1512_s10 = smov 0  }
   0xc   :  { %s1514_s11 = smov 0   ;;  %s1516_s12 = smov 0  }
   0xd   :  { %s1518_s13 = smov 0   ;;  %s1520_s14 = smov 0  }
   0xe LB: > { %s1541_s15 = sadd.s32 4294967295, %s1447_s14   ;;  %s1808_s16 = sadd.s32 4294967294, %s1447_s14   ;;  %s1447_s14 = sphi %s1520_s14, %s31_s14   ;;  %s1443_s13 = sphi %s1518_s13, %s1844_s13   ;;  %s1439_s12 = sphi %s1516_s12, %s1843_s12   ;;  %s1435_s11 = sphi %s1514_s11, %s1842_s11   ;;  %s1431_s10 = sphi %s1512_s10, %s1841_s10   ;;  %s1427_s30 = sphi %s1510_s30, %s1840_s30  }
   0xf   : > { %p63_p0 = scmp.ne.s32.totalorder %s1431_s10, %s1427_s30  ;;  %p1807_p1 = scmp.eq.s32.totalorder %s1541_s15, 0 }
  0x10   : > { %p251_p3 = scmp.eq.s32.totalorder %s1808_s16, 1  ;;  %p1010_p5 = scmp.ge.s32.totalorder %s1447_s14, 1 }
  0x11   : > { %p1552_p4 = por %p1807_p1, %p63_p0  ;;  %p314_p7 = scmp.lt.s32.totalorder %s1447_s14, 3 }
  0x12   : > { %p1557_p6 = por %p251_p3, %p63_p0  ;;  %s1449_s20 = smov [#allocation5]  }
  0x13   : > { %s1816_s17 = scalar_select %p1552_p4, 1, 0 }
  0x14   : > { %s1817_s18 = scalar_select %p1557_p6, 1, 0 }
  0x15   : > { %p1562_p8 = pnand %p1010_p5, %p314_p7  ;;  %s328_s21 = sshll.u32 %s1449_s20, 4  ;;  %s329_s21 = int_to_ptr.vmem [resolvable:$true] %s328_s21 }
  0x16   : > { %1818 = sst [smem:[#allocation19_spill]] %s1817_s18  ;;  %s1450_s23 = smov [#allocation7]  }
  0x17   : > { %p1110_p9 = pneg %p1562_p8  ;;  %s343_s24 = sshll.u32 %s1450_s23, 4  ;;  %s344_s24 = int_to_ptr.vmem [resolvable:$true] %s343_s24 }
  0x18   : > { %s1451_s25 = smov [#allocation8]   ;;  %s1208_s27 = scalar_lea.vmem %s329_s21, 512 }
  0x19   : > { %p1571_p11 = pnand %p1110_p9, %p1807_p1  ;;  %s358_s26 = sshll.u32 %s1451_s25, 4  ;;  %s359_s26 = int_to_ptr.vmem [resolvable:$true] %s358_s26 }
  0x1a   : > { %p1209_p13 = scmp.ne.s32.totalorder %s329_s21, %s1208_s27  ;;  %p1216_p5 = scmp.lt.s32.totalorder %s329_s21, %s329_s21 }
  0x1b   : > { %p1199_p12 = pneg %p1571_p11  ;;  %p1217_p7 = scmp.lt.s32.totalorder %s1208_s27, %s1208_s27 }
  0x1d   : > { %p1211_p0 = pnand %p1209_p13, %p1199_p12  ;;  %p1218_p9 = por %p1217_p7, %p1216_p5 }
  0x1f   : > { %p1212_p3 = pneg %p1211_p0 }
  0x21   : > { %p1219_p10 = pnand %p1218_p9, %p1212_p3 }
  0x23   : > { %1222 = shalt.err (!%p1219_p10)
}
  0x24   : > { %s1452_s28 = smov 128   ;;  %s1453_s29 = smov 8  }
  0x25   : > { %s1821_s1 = sld [smem:[#allocation21_spill]]  ;;  %s1234_s25 = scalar_lea.vmem %s344_s24, 512 }
  0x26   : > { %p1235_p1 = scmp.ne.s32.totalorder %s344_s24, %s1234_s25  ;;  %p1242_p2 = scmp.lt.s32.totalorder %s344_s24, %s344_s24 }
  0x27   : > { %p1243_p6 = scmp.lt.s32.totalorder %s1234_s25, %s1234_s25 }
  0x28   : > { %p1237_p13 = pnand %p1235_p1, %p1199_p12 }
  0x29   : > { %p1244_p5 = por %p1243_p6, %p1242_p2 }
  0x2a   : > { %p1238_p0 = pneg %p1237_p13 }
  0x2b   : > { %1113 = dma.hbm_to_vmem [thread:$0]  (!%p1571_p11), %s1821_s1, 512, %s329_s21, [#allocation6], %s1452_s28, %s1452_s28, %s1453_s29  }
  0x2c   : > { %p1245_p3 = pnand %p1244_p5, %p1238_p0 }
  0x2e   : > { %1248 = shalt.err (!%p1245_p3)
}
  0x2f   : > { %s1822_s2 = sld [smem:[#allocation22_spill]]  ;;  %s1260_s21 = scalar_lea.vmem %s359_s26, 512 }
  0x30   : > { %p1261_p10 = scmp.ne.s32.totalorder %s359_s26, %s1260_s21  ;;  %p1268_p9 = scmp.lt.s32.totalorder %s359_s26, %s359_s26 }
  0x31   : > { %p1269_p13 = scmp.lt.s32.totalorder %s1260_s21, %s1260_s21 }
  0x32   : > { %p1263_p7 = pnand %p1261_p10, %p1199_p12 }
  0x33   : > { %p1270_p4 = por %p1269_p13, %p1268_p9 }
  0x34   : > { %p1264_p1 = pneg %p1263_p7 }
  0x35   : > { %1116 = dma.hbm_to_vmem [thread:$0]  (!%p1571_p11), %s1822_s2, 512, %s344_s24, [#allocation6], %s1452_s28, %s1452_s28, %s1453_s29  }
  0x36   : > { %p1271_p2 = pnand %p1270_p4, %p1264_p1 }
  0x38   : > { %1274 = shalt.err (!%p1271_p2)
}
  0x39   : > { %s1823_s3 = sld [smem:[#allocation23_spill]]  ;;  %s50_s16 = sadd.s32 1, %s1435_s11 }
  0x3a   : > { %s43_s24 = sadd.s32 1, %s1443_s13  ;;  %p57_p4 = scmp.ne.s32.totalorder %s1435_s11, %s1431_s10 }
  0x3b   : > { %p45_p6 = scmp.ge.s32.totalorder %s43_s24, 2  ;;  %p58_p12 = scmp.eq.s32.totalorder %s1447_s14, 0 }
  0x3c   : > { %p1824_p0 = scmp.eq.s32.totalorder %s1541_s15, 1  ;;  %p1137_p3 = scmp.lt.s32.totalorder %s1447_s14, 2 }
  0x3d   : > { %s1846_s24 = smov (%p45_p6, %s43_s24), 0  ;;  %p59_p10 = por %p58_p12, %p57_p4 }
  0x3e   : > { %p1608_p5 = por %p1824_p0, %p57_p4  ;;  %1826 = sst [smem:[#allocation20_spill]] %s1846_s24 }
  0x3f   : > { %1119 = dma.hbm_to_vmem [thread:$0]  (!%p1571_p11), %s1823_s3, 512, %s359_s26, [#allocation9], %s1452_s28, %s1452_s28, %s1453_s29  }
  0x40   : > { %s390_s25 = sand.u32 1, %s1435_s11   ;;  %s47_s27 = ssub.s32 %s1443_s13, %s1846_s24 }
  0x41   : > { %p48_p7 = scmp.eq.s32.totalorder %s47_s27, 0  ;;  %s1018_s26 = sshll.u32 %s390_s25, 3 }
  0x42   : > { %s1019_s28 = sshll.u32 %s1443_s13, 7  ;;  %s394_s1 = scalar_lea.vmem [#allocation2], %s1018_s26 }
  0x43   : > { %s1620_s29 = scalar_select %p48_p7, %s1435_s11, %s50_s16  }
  0x44   : > { %s399_s23 = scalar_lea.hbm %s1797_s0, %s1019_s28  ;;  %s401_s2 = sshll.u32 %s394_s1, 4  ;;  %s402_s2 = int_to_ptr.vmem [resolvable:$true] %s401_s2 }
  0x45   : > { %p1627_p11 = pnand %p1137_p3, %p59_p10  ;;  %s391_s18 = scalar_lea.sflag [#allocation3], %s390_s25 }
  0x46   : > { %s1288_s27 = scalar_lea.vmem %s402_s2, 128  ;;  %s1454_s16 = smov [#allocation2]  }
  0x47   : > { %p1277_p1 = pneg %p1627_p11  ;;  %p1289_p9 = scmp.ne.s32.totalorder %s402_s2, %s1288_s27 }
  0x48   : > { %s1293_s24 = sshll.u32 %s1454_s16, 4  ;;  %s1294_s24 = int_to_ptr.vmem [resolvable:$false] %s1293_s24 }
  0x49   : > { %p1291_p13 = pnand %p1289_p9, %p1277_p1  ;;  %s1295_s28 = scalar_lea.vmem %s1294_s24, 256 }
  0x4a   : > { %p1296_p4 = scmp.lt.s32.totalorder %s402_s2, %s1294_s24  ;;  %p1297_p6 = scmp.lt.s32.totalorder %s1295_s28, %s1288_s27 }
  0x4b   : > { %p1292_p2 = pneg %p1291_p13 }
  0x4c   : > { %p1298_p12 = por %p1297_p6, %p1296_p4 }
  0x4e   : > { %p1299_p0 = pnand %p1298_p12, %p1292_p2 }
  0x50   : > { %1302 = shalt.err (!%p1299_p0)
}
  0x51   : > { %1123 = dma.hbm_to_vmem [thread:$0]  (!%p1627_p11), %s399_s23, 128, %s402_s2, %s391_s18  }
  0x52   : > { %410 = sbr.rel (%p1562_p8) target bundleno = 359 (0x167), region = 48  ;;  %s1638_s1 = sand.u32 (!%p1562_p8), 1, %s1431_s10  }
  0x53   : > { %s1641_s25 = sshll.u32 (!%p1562_p8), %s1638_s1, 3  ;;  %s413_s24 = scalar_lea.sflag (!%p1562_p8), [#allocation3], %s1638_s1 }
  0x54   : > { %s416_s26 = scalar_lea.vmem (!%p1562_p8), [#allocation2], %s1641_s25  ;;  %p1828_p3 = scmp.ne.s32.totalorder (!%p1562_p8), %s1816_s17, 0 }
  0x57   : > { %1406 = dma.done.wait (%p1828_p3), %s413_s24, 128  }
  0x58   : > { %1408 = vsyncadd (%p1828_p3), %s413_s24, 4294967168  ;;  %p1829_p10 = scmp.eq.s32.totalorder %s1541_s15, 0 }
  0x5a   : > { %1410 = dma.done.wait (%p1829_p10), [#allocation6], 1024   ;;  %p1830_p8 = pmov %p1829_p10 }
  0x5c   : > { %1412 = vsyncadd (%p1830_p8), [#allocation6], 4294966272  ;;  %p1831_p7 = pmov %p1830_p8 }
  0x5e   : > { %1414 = dma.done.wait (%p1831_p7), [#allocation9], 512   ;;  %p1832_p11 = pmov %p1831_p7 }
  0x5f   : > { %v1455_v0 = vmov 0.0   ;;  %vm1456_vm0 = vmmov 0   ;;  %v495_v1 = vld [vmem:[#allocation5 + $0x18] sm:$0xff]  ;;  %v494_v2 = vld [vmem:[#allocation5 + $0x10] sm:$0xff]  ;;  %v493_v4 = vld [vmem:[#allocation5 + $0x8] sm:$0xff]  ;;  %vm503_vm1 = vcmask 261120  }
  0x60   : > { %1416 = vsyncadd (%p1832_p11), [#allocation9], 4294966784  ;;  %1057 = vmatprep.subr.mxu0 %v1455_v0  ;;  %1068 = vmatprep.subr.mxu1 %v1455_v0  ;;  %v581_v3 = vld [vmem:[#allocation7 + $0x18] sm:$0xff]  ;;  %v580_v5 = vld [vmem:[#allocation7 + $0x10] sm:$0xff]  ;;  %s1667_s17 = sshll.u32 %s1439_s12, 7  ;;  %s467_s18 = scalar_lea.vmem [#allocation10], %s1641_s25 }
  0x61   : > { %1065 = vmatprep.mubr.msk.f32.mxu0 %vm1456_vm0, %v1455_v0  ;;  %1076 = vmatprep.mubr.msk.f32.mxu1 %vm1456_vm0, %v1455_v0  ;;  %v579_v6 = vld [vmem:[#allocation7 + $0x8] sm:$0xff]  ;;  %v492_v7 = vld [vmem:[#allocation5] sm:$0xff]  ;;  %v491_v8 = vld [vmem:[%s416_s26] sm:$0xff]  ;;  %s767_s19 = sshll.u32 %s467_s18, 4  ;;  %s1812_s27 = scalar_lea.vmem [#allocation11], %s1641_s25  ;;  %s1683_s19 = int_to_ptr.vmem [resolvable:$true] %s767_s19 }
  0x62   : > { %1058 = vmatpush3.msra.mxu0 %v495_v1  ;;  %1069 = vmatpush3.msra.mxu1 %v581_v3  ;;  %v663_v9 = vld [vmem:[#allocation8 + $0x18] sm:$0xff]  ;;  %v578_v10 = vld [vmem:[#allocation7] sm:$0xff]  ;;  %v662_v11 = vld [vmem:[#allocation8 + $0x10] sm:$0xff]  ;;  %s781_s16 = sshll.u32 %s1812_s27, 4  ;;  %s1681_s12 = scalar_lea.hbm %s1804_s7, %s1667_s17  ;;  %s1691_s16 = int_to_ptr.vmem [resolvable:$true] %s781_s16 }
  0x63   : > { %1059 = vmatprep.subr.mxu0 %v1455_v0  ;;  %1070 = vmatprep.subr.mxu1 %v1455_v0  ;;  %v661_v12 = vld [vmem:[#allocation8 + $0x8] sm:$0xff]  ;;  %v660_v13 = vld [vmem:[#allocation8] sm:$0xff]  ;;  %v1028_v14 = vld [vmem:[%s1801_s4] ss:$0 sm:$0xff]  ;;  %s1689_s3 = scalar_lea.hbm %s1805_s8, %s1667_s17  ;;  %s743_s20 = scalar_lea.sflag [#allocation4], %s1638_s1 }
  0x64   : > { %1060 = vmatpush3.msra.mxu0 %v494_v2  ;;  %1071 = vmatpush3.msra.mxu1 %v580_v5  ;;  %v1030_v16 = vld [vmem:[%s1802_s5] ss:$0 sm:$0xff]  ;;  %s1303_s23 = scalar_lea.vmem %s1683_s19, 128  ;;  %s1457_s28 = smov [#allocation10]  }
  0x65   : > { %1061 = vmatprep.subr.mxu0 %v1455_v0  ;;  %1072 = vmatprep.subr.mxu1 %v1455_v0  ;;  %p1304_p1 = scmp.ne.s32.totalorder %s1683_s19, %s1303_s23  ;;  %s1307_s24 = sshll.u32 %s1457_s28, 4  ;;  %s1308_s24 = int_to_ptr.vmem [resolvable:$false] %s1307_s24 }
  0x66   : > { %1062 = vmatpush3.msra.mxu0 %v493_v4  ;;  %1073 = vmatpush3.msra.mxu1 %v579_v6  ;;  %s1309_s21 = scalar_lea.vmem %s1308_s24, 256  ;;  %p1310_p2 = scmp.lt.s32.totalorder %s1683_s19, %s1308_s24 }
  0x67   : > { %1063 = vmatprep.subr.mxu0 %v1455_v0  ;;  %1074 = vmatprep.subr.mxu1 %v1455_v0  ;;  %p1305_p9 = pnand %p1304_p1, %p1608_p5  ;;  %p1311_p4 = scmp.lt.s32.totalorder %s1309_s21, %s1303_s23 }
  0x68   : > { %1064 = vmatpush3.msra.mxu0 %v492_v7  ;;  %1075 = vmatpush3.msra.mxu1 %v578_v10 }
  0x69   : > { %1066 = vmatmul.mubr.msk.f32.vlgmr.msra.gmra.mxu0 %vm503_vm1, %v491_v8  ;;  %1079 = vmatprep.subr.mxu0 %v1455_v0  ;;  %p1306_p13 = pneg %p1305_p9  ;;  %p1312_p6 = por %p1311_p4, %p1310_p2 }
  0x6a   : > { %1080 = vmatpush3.msra.mxu0 %v663_v9  ;;  %1077 = vmatmul.mubr.msk.f32.vlgmr.msra.gmra.mxu1 %vm503_vm1, %v491_v8 }
  0x6b   : > { %1081 = vmatprep.subr.mxu0 %v1455_v0  ;;  %1087 = vmatprep.mubr.msk.f32.mxu0 %vm1456_vm0, %v1455_v0  ;;  %p1313_p12 = pnand %p1312_p6, %p1306_p13 }
  0x6c   : > { %1082 = vmatpush3.msra.mxu0 %v662_v11 }
  0x6d   : > { %1083 = vmatprep.subr.mxu0 %v1455_v0 }
  0x6e   : > { %1084 = vmatpush3.msra.mxu0 %v661_v12 }
  0x6f   : > { %1085 = vmatprep.subr.mxu0 %v1455_v0 }
  0x70   : > { %1086 = vmatpush3.msra.mxu0 %v660_v13 }
  0x71   : > { %1088 = vmatmul.mubr.msk.f32.vlgmr.msra.gmra.mxu0 %vm503_vm1, %v491_v8 }
 0x129   : > { %v573_v15 = vpop.f32.mrf.mxu0 }
 0x12a   : > { %v574_v17 = vadd.f32 %v1028_v14, %v573_v15  ;;  %v655_v19 = vpop.f32.mrf.mxu1 }
 0x12b   : > { %v1067_v18 = vpop.f32.mrf.mxu0  ;;  %v656_v20 = vadd.f32 %v1030_v16, %v655_v19 }
 0x12c   : > { %577 = vst.msk [vmem:[%s467_s18] sm:$0xff] %vm503_vm1, %v574_v17  ;;  %v1078_v21 = vpop.f32.mrf.mxu1 }
 0x12d   : > { %1316 = shalt.err (!%p1313_p12)
}
 0x12e   : > { %s1317_s18 = scalar_lea.hbm %s1681_s12, 128  ;;  %s1321_s2 = scalar_lea.hbm %s1804_s7, 256 }
 0x12f   : > { %p1318_p0 = scmp.ne.s32.totalorder %s1681_s12, %s1317_s18  ;;  %p1322_p8 = scmp.lt.s32.totalorder %s1681_s12, %s1804_s7 }
 0x130   : > { %p1323_p7 = scmp.lt.s32.totalorder %s1321_s2, %s1317_s18 }
 0x131   : > { %p1319_p3 = pnand %p1318_p0, %p1608_p5 }
 0x132   : > { %p1324_p11 = por %p1323_p7, %p1322_p8 }
 0x133   : > { %p1320_p10 = pneg %p1319_p3 }
 0x135   : > { %p1325_p1 = pnand %p1324_p11, %p1320_p10 }
 0x137   : > { %1328 = shalt.err (!%p1325_p1)
}
 0x138   : > { %1104 = dma.vmem_to_hbm [thread:$0]  (%p1608_p5), %s1683_s19, 128, %s1681_s12, %s743_s20   ;;  %v1032_v22 = vld [vmem:[%s1803_s6] ss:$0 sm:$0xff] }
 0x139   : > { %s1833_s21 = scalar_lea.vmem [#allocation11], %s1641_s25  ;;  %s481_s27 = scalar_lea.vmem [#allocation13], %s1641_s25 }
 0x13a   : > { %659 = vst.msk [vmem:[%s1833_s21] sm:$0xff] %vm503_vm1, %v656_v20  ;;  %s1721_s23 = sshll.u32 %s481_s27, 4  ;;  %s1834_s1 = sand.u32 1, %s1541_s15   ;;  %s796_s23 = int_to_ptr.vmem [resolvable:$true] %s1721_s23 }
 0x13b   : > { %s1728_s26 = scalar_lea.sflag [#allocation12], %s1834_s1  ;;  %s1329_s2 = scalar_lea.vmem %s1691_s16, 128 }
 0x13c   : > { %p1330_p9 = scmp.ne.s32.totalorder %s1691_s16, %s1329_s2  ;;  %s1458_s19 = smov [#allocation11]  }
 0x13d   : > { %s1333_s12 = sshll.u32 %s1458_s19, 4  ;;  %s1334_s12 = int_to_ptr.vmem [resolvable:$false] %s1333_s12 }
 0x13e   : > { %p1331_p13 = pnand %p1330_p9, %p1608_p5  ;;  %s1335_s20 = scalar_lea.vmem %s1334_s12, 256 }
 0x13f   : > { %p1336_p4 = scmp.lt.s32.totalorder %s1691_s16, %s1334_s12  ;;  %p1337_p6 = scmp.lt.s32.totalorder %s1335_s20, %s1329_s2 }
 0x140   : > { %p1332_p2 = pneg %p1331_p13 }
 0x141   : > { %p1338_p12 = por %p1337_p6, %p1336_p4 }
 0x143   : > { %p1339_p0 = pnand %p1338_p12, %p1332_p2 }
 0x145   : > { %1342 = shalt.err (!%p1339_p0)
}
 0x146   : > { %s1343_s15 = scalar_lea.hbm %s1689_s3, 128  ;;  %s1347_s24 = scalar_lea.hbm %s1805_s8, 256 }
 0x147   : > { %p1344_p3 = scmp.ne.s32.totalorder %s1689_s3, %s1343_s15  ;;  %p1348_p7 = scmp.lt.s32.totalorder %s1689_s3, %s1805_s8 }
 0x148   : > { %p1349_p11 = scmp.lt.s32.totalorder %s1347_s24, %s1343_s15 }
 0x149   : > { %p1345_p10 = pnand %p1344_p3, %p1608_p5 }
 0x14a   : > { %p1350_p1 = por %p1349_p11, %p1348_p7 }
 0x14b   : > { %p1346_p8 = pneg %p1345_p10 }
 0x14d   : > { %p1351_p9 = pnand %p1350_p1, %p1346_p8 }
 0x14f   : > { %1354 = shalt.err (!%p1351_p9)
}
 0x150   : > { %1105 = dma.vmem_to_hbm [thread:$0]  (%p1608_p5), %s1691_s16, 128, %s1689_s3, %s1728_s26   ;;  %v737_v23 = vpop.f32.mrf.mxu0 }
 0x151   : > { %v738_v24 = vadd.f32 %v1032_v22, %v737_v23  ;;  %s793_s12 = scalar_lea.hbm %s1806_s9, %s1667_s17  ;;  %s1355_s20 = scalar_lea.vmem %s796_s23, 128 }
 0x152   : > { %v1089_v25 = vpop.f32.mrf.mxu0  ;;  %p1356_p13 = scmp.ne.s32.totalorder %s796_s23, %s1355_s20  ;;  %s1459_s15 = smov [#allocation13]  }
 0x153   : > { %741 = vst.msk [vmem:[%s481_s27] sm:$0xff] %vm503_vm1, %v738_v24  ;;  %s1359_s28 = sshll.u32 %s1459_s15, 4  ;;  %s1360_s28 = int_to_ptr.vmem [resolvable:$false] %s1359_s28 }
 0x154   : > { %p1357_p2 = pnand %p1356_p13, %p1608_p5  ;;  %s1361_s16 = scalar_lea.vmem %s1360_s28, 256 }
 0x155   : > { %p1362_p6 = scmp.lt.s32.totalorder %s796_s23, %s1360_s28  ;;  %p1363_p12 = scmp.lt.s32.totalorder %s1361_s16, %s1355_s20 }
 0x156   : > { %p1358_p4 = pneg %p1357_p2 }
 0x157   : > { %p1364_p0 = por %p1363_p12, %p1362_p6 }
 0x159   : > { %p1365_p3 = pnand %p1364_p0, %p1358_p4 }
 0x15b   : > { %1368 = shalt.err (!%p1365_p3)
}
 0x15c   : > { %s1369_s17 = scalar_lea.hbm %s793_s12, 128  ;;  %s1373_s27 = scalar_lea.hbm %s1806_s9, 256 }
 0x15d   : > { %p1370_p10 = scmp.ne.s32.totalorder %s793_s12, %s1369_s17  ;;  %p1374_p11 = scmp.lt.s32.totalorder %s793_s12, %s1806_s9 }
 0x15e   : > { %p1375_p1 = scmp.lt.s32.totalorder %s1373_s27, %s1369_s17 }
 0x15f   : > { %p1371_p8 = pnand %p1370_p10, %p1608_p5 }
 0x160   : > { %p1376_p9 = por %p1375_p1, %p1374_p11 }
 0x161   : > { %p1372_p7 = pneg %p1371_p8 }
 0x163   : > { %p1377_p13 = pnand %p1376_p9, %p1372_p7 }
 0x165   : > { %1380 = shalt.err (!%p1377_p13)
}
 0x166   : > { %1106 = dma.vmem_to_hbm [thread:$0]  (%p1608_p5), %s796_s23, 128, %s793_s12, %s1728_s26  }
 0x167 PF: > { %s1835_s18 = sld [smem:[#allocation19_spill]]  ;;  %s807_s1 = sand.u32 1, %s1427_s30  }
 0x168   : > { %p1837_p4 = scmp.ge.s32.totalorder %s1447_s14, 2  ;;  %s808_s2 = scalar_lea.sflag [#allocation4], %s807_s1 }
 0x16d   : > { %p1836_p2 = scmp.ne.s32.totalorder %s1835_s18, 0 }
 0x16f   : > { %p1125_p6 = pnand %p1837_p4, %p1836_p2 }
 0x171   : > { %p1126_p12 = pneg %p1125_p6 }
 0x173   : > { %1418 = dma.done.wait (%p1126_p12), %s808_s2, 128  }
 0x174   : > { %1420 = vsyncadd (%p1126_p12), %s808_s2, 4294967168  ;;  %s1838_s19 = sadd.s32 4294967294, %s1447_s14  }
 0x175   : > { %s816_s20 = sand.u32 1, %s1838_s19  }
 0x176   : > { %s817_s15 = scalar_lea.sflag [#allocation12], %s816_s20 }
 0x177   : > { %1422 = dma.done.wait (%p1126_p12), %s817_s15, 256  }
 0x178   : > { %1424 = vsyncadd (%p1126_p12), %s817_s15, 4294967040  ;;  %s31_s14 = sadd.s32 1, %s1447_s14   ;;  %s1839_s22 = sld [smem:[#allocation20_spill]] }
 0x179   : > { %p28_p5 = scmp.ge.s32.totalorder %s31_s14, 4   ;;  %s1840_s30 = smov %s1431_s10 }
 0x17a   : > { %s1841_s10 = smov %s1435_s11  ;;  %s1842_s11 = smov %s1620_s29 }
 0x17b   : > { %s1843_s12 = smov %s1443_s13  ;;  %30 = sbr.rel (!%p28_p5) target bundleno = 14 (0xe), region = 149 }
 0x17e   : > { %s1844_s13 = smov %s1839_s22 }
 0x180   :  { %831 = vsyncpa [#allocation3], 1 }
 0x181   :  { %833 = vsyncpa [#allocation3 + $0x1], 1 }
 0x182   :  { %834 = vsyncpa [#allocation6], 1 }
 0x183   :  { %835 = vsyncpa [#allocation9], 1 }
 0x184   :  { %836 = vsyncpa [#allocation4], 1 }
 0x185   :  { %838 = vsyncpa [#allocation4 + $0x1], 1 }
 0x186   :  { %839 = vsyncpa [#allocation12], 1 }
 0x187   :  { %841 = vsyncpa [#allocation12 + $0x1], 1 }

</bundles_post_ra>
